<compile_context>
chip_gen: v5e
topology: v5e:2x2
jax: 0.10.0
libtpu: 0.0.40
codegen_flags: <defaults>
</compile_context>

<pallas_src>
import jax
import jax.numpy as jnp
from jax.experimental import pallas as pl
from jax.experimental.pallas import tpu as pltpu

IN_DIM = 3
HIDDEN = 64
HIDDEN_PAD = 128          # 64 -> 128: lane-clean K for the MXU
OUT_DIM = 28 * 28         # 784
OUT_PAD = 896             # 7 * 128: lane-dense output stores


def _round_up(n, m):
    return ((n + m - 1) // m) * m


def decoder_kernel(x_ref, w1_ref, b1_ref, w2_ref, b2_ref, o_ref):
    # ---- Layer 1: Linear(3 -> 64[padded 128]) + ReLU, on the VPU ----------
    # K = 3 is <3% of an MXU pass; 3 broadcast-FMAs on the VALU slots are
    # effectively free and leave the MXU free for the second matmul.
    x = x_ref[...]                                        # (TB, 3)  f32
    h = (x[:, 0:1] * w1_ref[0:1, :]
         + x[:, 1:2] * w1_ref[1:2, :]
         + x[:, 2:3] * w1_ref[2:3, :]
         + b1_ref[...])                                   # (TB, 128) f32
    h = jnp.maximum(h, 0.0)

    # ---- Layer 2: Linear(64[128] -> 784[896]) on the MXU -------------------
    # bf16 inputs, f32 accumulation; bias add in f32.
    y = jnp.dot(h.astype(jnp.bfloat16), w2_ref[...],
                preferred_element_type=jnp.float32)       # (TB, 896) f32
    y = y + b2_ref[...]
    o_ref[...] = y.astype(o_ref.dtype)


def decoder_forward(x, w1, b1, w2, b2, *, block_b=512, out_dtype=jnp.float32):
    """Forward pass of the Decoder.

    x : (B, 3)  float32
    w1: (3, 64) float32   (PyTorch W1.T)     b1: (64,)  float32
    w2: (64, 784) float32 (PyTorch W2.T)     b2: (784,) float32
    returns (B, 784) in `out_dtype` (default float32).
    """
    B, in_dim = x.shape
    assert in_dim == IN_DIM

    # Pad hidden 64 -> 128 and output 784 -> 896 (zeros => numerically inert).
    w1p = jnp.pad(w1, ((0, 0), (0, HIDDEN_PAD - HIDDEN))).astype(jnp.float32)
    b1p = jnp.pad(b1.reshape(1, HIDDEN),
                  ((0, 0), (0, HIDDEN_PAD - HIDDEN))).astype(jnp.float32)
    # Second-layer weights in bf16 (halves weight DMA; MXU-native on v6e/v7x).
    w2p = jnp.pad(w2, ((0, HIDDEN_PAD - HIDDEN),
                       (0, OUT_PAD - OUT_DIM))).astype(jnp.bfloat16)
    b2p = jnp.pad(b2.reshape(1, OUT_DIM),
                  ((0, 0), (0, OUT_PAD - OUT_DIM))).astype(jnp.float32)

    # Batch tile: stream x / out through the pipeline, weights stay resident.
    tb = min(block_b, _round_up(B, 8))
    tb = _round_up(tb, 8)
    Bp = _round_up(B, tb)
    xp = jnp.pad(x, ((0, Bp - B), (0, 0))) if Bp != B else x
    grid = (Bp // tb,)

    cost = pl.CostEstimate(
        flops=2 * B * (IN_DIM * HIDDEN + HIDDEN * OUT_DIM),
        transcendentals=0,
        bytes_accessed=(Bp * (IN_DIM * 4 + OUT_PAD * 4)
                        + w1p.size * 4 + b1p.size * 4
                        + w2p.size * 2 + b2p.size * 4),
    )

    out = pl.pallas_call(
        decoder_kernel,
        out_shape=jax.ShapeDtypeStruct((Bp, OUT_PAD), out_dtype),
        grid_spec=pltpu.PrefetchScalarGridSpec(
            num_scalar_prefetch=0,
            grid=grid,
            in_specs=[
                pl.BlockSpec((tb, IN_DIM), lambda i: (i, 0)),           # x (streamed)
                pl.BlockSpec((IN_DIM, HIDDEN_PAD), lambda i: (0, 0)),   # w1 (resident)
                pl.BlockSpec((1, HIDDEN_PAD), lambda i: (0, 0)),        # b1 (resident)
                pl.BlockSpec((HIDDEN_PAD, OUT_PAD), lambda i: (0, 0)),  # w2 (resident)
                pl.BlockSpec((1, OUT_PAD), lambda i: (0, 0)),           # b2 (resident)
            ],
            out_specs=pl.BlockSpec((tb, OUT_PAD), lambda i: (i, 0)),
        ),
        compiler_params=pltpu.CompilerParams(
            dimension_semantics=("parallel",),      # megacore / 2 TCs on v7x
            vmem_limit_bytes=32 * 1024 * 1024,      # safe on v5e/v6e/v7x
        ),
        cost_estimate=cost,
    )(xp, w1p, b1p, w2p, b2p)

    return out[:B, :OUT_DIM]


def init_params(key):
    """Deterministic parameter init mimicking the PyTorch module's shapes.

    PyTorch:  Linear(3, 64)   -> W1 (64, 3),   b1 (64,)
              Linear(64, 784) -> W2 (784, 64), b2 (784,)
    We store weights pre-transposed: (in, out).
    """
    k1, k2, k3, k4 = jax.random.split(key, 4)
    lim1 = 1.0 / (3.0 ** 0.5)
    lim2 = 1.0 / (64.0 ** 0.5)
    w1 = jax.random.uniform(k1, (IN_DIM, HIDDEN), jnp.float32, -lim1, lim1)
    b1 = jax.random.uniform(k2, (HIDDEN,), jnp.float32, -lim1, lim1)
    w2 = jax.random.uniform(k3, (HIDDEN, OUT_DIM), jnp.float32, -lim2, lim2)
    b2 = jax.random.uniform(k4, (OUT_DIM,), jnp.float32, -lim2, lim2)
    return w1, b1, w2, b2


if __name__ == "__main__":
    key = jax.random.PRNGKey(0)
    kx, kp = jax.random.split(key)

    B = 8  # small demo batch (any B works; rows are padded to the batch tile)
    x = jax.random.normal(kx, (B, IN_DIM), jnp.float32)
    w1, b1, w2, b2 = init_params(kp)

    out = decoder_forward(x, w1, b1, w2, b2)
    out = jax.block_until_ready(out)
    assert out.shape == (B, OUT_DIM), out.shape

    # Reference 1: same math with the same bf16 quantization of the second
    # layer (tight tolerance — checks the kernel itself).
    h_ref = jnp.maximum(x @ w1 + b1[None, :], 0.0)
    ref_bf16 = jnp.dot(h_ref.astype(jnp.bfloat16), w2.astype(jnp.bfloat16),
                       preferred_element_type=jnp.float32) + b2[None, :]
    assert jnp.allclose(out, ref_bf16, atol=2e-3, rtol=2e-3), \
        "mismatch vs bf16-quantized reference"

    # Reference 2: full-f32 PyTorch-equivalent math (loose tolerance — checks
    # the module semantics; bf16 second-layer weights cost ~3 decimal digits).
    ref_f32 = h_ref @ w2 + b2[None, :]
    assert jnp.allclose(out, ref_f32, atol=3e-2, rtol=3e-2), \
        "mismatch vs f32 reference"

    print("KERNEL_OK")
</pallas_src>

<mosaic_0001>
module attributes {stable_mosaic.version = 11 : i64} {
  func.func @decoder_kernel(%arg0: i32, %arg1: memref<8x3xf32, #tpu.memory_space<vmem>>, %arg2: memref<3x128xf32, #tpu.memory_space<vmem>>, %arg3: memref<1x128xf32, #tpu.memory_space<vmem>>, %arg4: memref<128x896xbf16, #tpu.memory_space<vmem>>, %arg5: memref<1x896xf32, #tpu.memory_space<vmem>>, %arg6: memref<8x896xf32, #tpu.memory_space<vmem>>) attributes {dimension_semantics = [#tpu.dimension_semantics<parallel>], iteration_bounds = array<i64: 1>, scalar_prefetch = 0 : i64, scratch_operands = 0 : i64, tpu.core_type = #tpu.core_type<tc>, window_params = [{transform_indices = @transform_0, window_bounds = array<i64: 8, 3>}, {pipeline_mode = #tpu.pipeline_mode<synchronous>, transform_indices = @transform_1, window_bounds = array<i64: 3, 128>}, {pipeline_mode = #tpu.pipeline_mode<synchronous>, transform_indices = @transform_2, window_bounds = array<i64: 1, 128>}, {pipeline_mode = #tpu.pipeline_mode<synchronous>, transform_indices = @transform_3, window_bounds = array<i64: 128, 896>}, {pipeline_mode = #tpu.pipeline_mode<synchronous>, transform_indices = @transform_4, window_bounds = array<i64: 1, 896>}, {transform_indices = @transform_5, window_bounds = array<i64: 8, 896>}]} {
    %c0 = arith.constant 0 : index
    %c0_0 = arith.constant 0 : index
    %0 = vector.load %arg1[%c0, %c0_0] : memref<8x3xf32, #tpu.memory_space<vmem>>, vector<8x3xf32>
    %1 = vector.extract_strided_slice %0 {offsets = [0, 0], sizes = [8, 1], strides = [1, 1]} : vector<8x3xf32> to vector<8x1xf32>
    %c0_1 = arith.constant 0 : index
    %c0_2 = arith.constant 0 : index
    %2 = vector.load %arg2[%c0_1, %c0_2] : memref<3x128xf32, #tpu.memory_space<vmem>>, vector<1x128xf32>
    %3 = vector.broadcast %1 : vector<8x1xf32> to vector<8x128xf32>
    %4 = vector.broadcast %2 : vector<1x128xf32> to vector<8x128xf32>
    %5 = arith.mulf %3, %4 : vector<8x128xf32>
    %6 = vector.extract_strided_slice %0 {offsets = [0, 1], sizes = [8, 1], strides = [1, 1]} : vector<8x3xf32> to vector<8x1xf32>
    %c1 = arith.constant 1 : index
    %c0_3 = arith.constant 0 : index
    %7 = vector.load %arg2[%c1, %c0_3] : memref<3x128xf32, #tpu.memory_space<vmem>>, vector<1x128xf32>
    %8 = vector.broadcast %6 : vector<8x1xf32> to vector<8x128xf32>
    %9 = vector.broadcast %7 : vector<1x128xf32> to vector<8x128xf32>
    %10 = arith.mulf %8, %9 : vector<8x128xf32>
    %11 = arith.addf %5, %10 : vector<8x128xf32>
    %12 = vector.extract_strided_slice %0 {offsets = [0, 2], sizes = [8, 1], strides = [1, 1]} : vector<8x3xf32> to vector<8x1xf32>
    %c2 = arith.constant 2 : index
    %c0_4 = arith.constant 0 : index
    %13 = vector.load %arg2[%c2, %c0_4] : memref<3x128xf32, #tpu.memory_space<vmem>>, vector<1x128xf32>
    %14 = vector.broadcast %12 : vector<8x1xf32> to vector<8x128xf32>
    %15 = vector.broadcast %13 : vector<1x128xf32> to vector<8x128xf32>
    %16 = arith.mulf %14, %15 : vector<8x128xf32>
    %17 = arith.addf %11, %16 : vector<8x128xf32>
    %c0_5 = arith.constant 0 : index
    %c0_6 = arith.constant 0 : index
    %18 = vector.load %arg3[%c0_5, %c0_6] : memref<1x128xf32, #tpu.memory_space<vmem>>, vector<1x128xf32>
    %19 = vector.broadcast %18 : vector<1x128xf32> to vector<8x128xf32>
    %20 = arith.addf %17, %19 : vector<8x128xf32>
    %cst = arith.constant 0.000000e+00 : f32
    %21 = vector.broadcast %cst : f32 to vector<8x128xf32>
    %22 = arith.maximumf %20, %21 : vector<8x128xf32>
    %23 = arith.truncf %22 : vector<8x128xf32> to vector<8x128xbf16>
    %c0_7 = arith.constant 0 : index
    %c0_8 = arith.constant 0 : index
    %24 = vector.load %arg4[%c0_7, %c0_8] : memref<128x896xbf16, #tpu.memory_space<vmem>>, vector<128x896xbf16>
    %cst_9 = arith.constant dense<0.000000e+00> : vector<8x896xf32>
    %25 = tpu.matmul %23, %24, %cst_9 {dimension_numbers = #tpu.dot_dimension_numbers<[1], [0], [0], [1], [0, 0, 1, 1], [], []>} : vector<8x128xbf16>, vector<128x896xbf16>, vector<8x896xf32> -> vector<8x896xf32>
    %c0_10 = arith.constant 0 : index
    %c0_11 = arith.constant 0 : index
    %26 = vector.load %arg5[%c0_10, %c0_11] : memref<1x896xf32, #tpu.memory_space<vmem>>, vector<1x896xf32>
    %27 = vector.broadcast %26 : vector<1x896xf32> to vector<8x896xf32>
    %28 = arith.addf %25, %27 : vector<8x896xf32>
    %c0_12 = arith.constant 0 : index
    %c0_13 = arith.constant 0 : index
    %29 = vector.load %arg6[%c0_12, %c0_13] : memref<8x896xf32, #tpu.memory_space<vmem>>, vector<8x896xf32>
    tpu.vector_store %arg6[%c0_12, %c0_13], %28 {strides = array<i32>} : memref<8x896xf32, #tpu.memory_space<vmem>>, vector<8x896xf32>,
    return
  }
  func.func @transform_0(%arg0: i32) -> (i32, i32) {
    %c0_i32 = arith.constant 0 : i32
    %c0_i32_0 = arith.constant 0 : i32
    return %arg0, %c0_i32 : i32, i32
  }
  func.func @transform_1(%arg0: i32) -> (i32, i32) {
    %c0_i32 = arith.constant 0 : i32
    %c0_i32_0 = arith.constant 0 : i32
    %c0_i32_1 = arith.constant 0 : i32
    return %c0_i32, %c0_i32_0 : i32, i32
  }
  func.func @transform_2(%arg0: i32) -> (i32, i32) {
    %c0_i32 = arith.constant 0 : i32
    %c0_i32_0 = arith.constant 0 : i32
    %c0_i32_1 = arith.constant 0 : i32
    return %c0_i32, %c0_i32_0 : i32, i32
  }
  func.func @transform_3(%arg0: i32) -> (i32, i32) {
    %c0_i32 = arith.constant 0 : i32
    %c0_i32_0 = arith.constant 0 : i32
    %c0_i32_1 = arith.constant 0 : i32
    return %c0_i32, %c0_i32_0 : i32, i32
  }
  func.func @transform_4(%arg0: i32) -> (i32, i32) {
    %c0_i32 = arith.constant 0 : i32
    %c0_i32_0 = arith.constant 0 : i32
    %c0_i32_1 = arith.constant 0 : i32
    return %c0_i32, %c0_i32_0 : i32, i32
  }
  func.func @transform_5(%arg0: i32) -> (i32, i32) {
    %c0_i32 = arith.constant 0 : i32
    %c0_i32_0 = arith.constant 0 : i32
    return %arg0, %c0_i32 : i32, i32
  }
}

</mosaic_0001>

<bundles_post_ra>
// kernel: tpu_custom_call.1
= control target key start
LH: loop header
LB: loop body
LE: loop exit
PB: predicated region body
PF: predicated region fallthrough
CT: control target
= control target key end

     0   :  { %10 = vsyncpa [#allocation3], 0  ;;  %s962_s0 = inlined_call_operand.vmem [shape: f32[8,3], index: 0, kind: input, shape index: {}]   ;;  %s963_s1 = inlined_call_operand.vmem [shape: f32[3,128], index: 1, kind: input, shape index: {}]   ;;  %s964_s2 = inlined_call_operand.vmem [shape: f32[1,128], index: 2, kind: input, shape index: {}]   ;;  %s965_s3 = inlined_call_operand.hbm [shape: bf16[128,896], index: 3, kind: input, shape index: {}]   ;;  %s966_s4 = inlined_call_operand.vmem [shape: f32[1,896], index: 4, kind: input, shape index: {}]   ;;  %s967_s5 = inlined_call_operand.hbm [shape: f32[8,896], index: 5, kind: output, shape index: {}]  }
   0x1   :  { %11 = vsyncpa [#allocation4], 0  ;;  %s22_s20 = sshll.u32 %s965_s3, 4  ;;  %s899_s21 = smov [#allocation2]   ;;  %s23_s20 = int_to_ptr.hbm [resolvable:$true] %s22_s20 }
   0x2   :  { %s24_s22 = sshll.u32 %s899_s21, 4  ;;  %s900_s23 = smov 448   ;;  %s25_s22 = int_to_ptr.vmem [resolvable:$true] %s24_s22 }
   0x3   :  { %s901_s24 = smov 28  }
   0x4   :  { %30 = dma.hbm_to_vmem [thread:$0]  %s23_s20, 7168, %s25_s22, [#allocation3], %s900_s23, %s900_s23, %s901_s24  }
   0x5   :  { %895 = dma.done.wait [#allocation3], 7168  }
   0x6   :  { %896 = vsyncadd [#allocation3], 4294960128  ;;  %v902_v0 = vmov 0   ;;  %v903_v1 = vmov 2   ;;  %v37_v2 = vld [vmem:[%s962_s0] sm:$0xff]  ;;  %v904_v33 = vmov 1  }
   0x7   :  { %839 = vset.pattern.permute.xlu0 %v902_v0  ;;  %841 = vset.pattern.permute.xlu1 %v903_v1  ;;  %v750_v3 = vld [vmem:[#allocation2 + $0x188] sm:$0xf]  ;;  %v828_v4 = vld [vmem:[#allocation2 + $0x1a0] sm:$0xf0]  ;;  %v825_v6 = vld [vmem:[#allocation2 + $0x18c] sm:$0xf] }
   0x8   :  { %41 = vperm.xlu0 %839, %v37_v2   ;;  %56 = vperm.xlu1 %841, %v37_v2   ;;  %v751_v5 = vor.u32 %v828_v4, %v750_v3  ;;  %v752_v7 = vld [vmem:[#allocation2 + $0x1a4] sm:$0xf0]  ;;  %v758_v8 = vld [vmem:[#allocation2 + $0x190] sm:$0xf]  ;;  %v829_v10 = vld [vmem:[#allocation2 + $0x1a8] sm:$0xf0] }
   0x9   :  { %v755_v9 = vor.u32 %v825_v6, %v752_v7  ;;  %v722_v11 = vld [vmem:[#allocation2 + $0x150] sm:$0xf]  ;;  %v821_v12 = vld [vmem:[#allocation2 + $0x168] sm:$0xf0]  ;;  %v759_v13 = vor.u32 %v829_v10, %v758_v8  ;;  %v818_v15 = vld [vmem:[#allocation2 + $0x154] sm:$0xf] }
   0xa   :  { %437 = vmatpush.bf16.msra.mxu0 %v751_v5  ;;  %v723_v14 = vor.u32 %v821_v12, %v722_v11  ;;  %v724_v16 = vld [vmem:[#allocation2 + $0x16c] sm:$0xf0]  ;;  %v730_v17 = vld [vmem:[#allocation2 + $0x158] sm:$0xf]  ;;  %v822_v19 = vld [vmem:[#allocation2 + $0x170] sm:$0xf0] }
   0xb   :  { %450 = vmatpush.bf16.msra.mxu1 %v755_v9  ;;  %v727_v18 = vor.u32 %v818_v15, %v724_v16  ;;  %v694_v20 = vld [vmem:[#allocation2 + $0x118] sm:$0xf]  ;;  %v814_v21 = vld [vmem:[#allocation2 + $0x130] sm:$0xf0]  ;;  %463 = vmatpush.bf16.msra.mxu2 %v759_v13  ;;  %v731_v22 = vor.u32 %v822_v19, %v730_v17  ;;  %v811_v23 = vld [vmem:[#allocation2 + $0x11c] sm:$0xf] }
   0xc   :  { %v696_v24 = vld [vmem:[#allocation2 + $0x134] sm:$0xf0]  ;;  %v702_v25 = vld [vmem:[#allocation2 + $0x120] sm:$0xf]  ;;  %v815_v26 = vld [vmem:[#allocation2 + $0x138] sm:$0xf0]  ;;  %v695_v27 = vor.u32 %v814_v21, %v694_v20 }
   0xd   :  { %v666_v28 = vld [vmem:[#allocation2 + $0xe0] sm:$0xf]  ;;  %v699_v29 = vor.u32 %v811_v23, %v696_v24  ;;  %v807_v30 = vld [vmem:[#allocation2 + $0xf8] sm:$0xf0]  ;;  %v826_v31 = vld [vmem:[#allocation2 + $0x194] sm:$0xf]  ;;  %v703_v34 = vor.u32 %v815_v26, %v702_v25 }
   0xe   :  { %438 = vmatpush.bf16.msra.mxu0 %v723_v14  ;;  %v760_v32 = vld [vmem:[#allocation2 + $0x1ac] sm:$0xf0]  ;;  %v804_v35 = vld [vmem:[#allocation2 + $0xe4] sm:$0xf]  ;;  %v668_v36 = vld [vmem:[#allocation2 + $0xfc] sm:$0xf0]  ;;  %v667_v40 = vor.u32 %v807_v30, %v666_v28 }
   0xf   :  { %451 = vmatpush.bf16.msra.mxu1 %v727_v18  ;;  %464 = vmatpush.bf16.msra.mxu2 %v731_v22  ;;  %v763_v37 = vor.u32 %v826_v31, %v760_v32  ;;  %v674_v38 = vld [vmem:[#allocation2 + $0xe8] sm:$0xf]  ;;  %v808_v39 = vld [vmem:[#allocation2 + $0x100] sm:$0xf0]  ;;  %v819_v41 = vld [vmem:[#allocation2 + $0x15c] sm:$0xf]  ;;  %v671_v43 = vor.u32 %v804_v35, %v668_v36 }
  0x10   :  { %840 = vset.pattern.permute.xlu0 %v904_v33  ;;  %v732_v42 = vld [vmem:[#allocation2 + $0x174] sm:$0xf0]  ;;  %v638_v44 = vld [vmem:[#allocation2 + $0xa8] sm:$0xf]  ;;  %v800_v45 = vld [vmem:[#allocation2 + $0xc0] sm:$0xf0]  ;;  %v675_v48 = vor.u32 %v808_v39, %v674_v38 }
  0x11   :  { %48 = vperm.xlu0 %840, %v37_v2   ;;  %476 = vmatpush.bf16.msra.mxu3 %v763_v37  ;;  %v797_v46 = vld [vmem:[#allocation2 + $0xac] sm:$0xf]  ;;  %v735_v47 = vor.u32 %v819_v41, %v732_v42  ;;  %v640_v49 = vld [vmem:[#allocation2 + $0xc4] sm:$0xf0]  ;;  %v646_v50 = vld [vmem:[#allocation2 + $0xb0] sm:$0xf]  ;;  %v639_v54 = vor.u32 %v800_v45, %v638_v44 }
  0x12   :  { %439 = vmatpush.bf16.msra.mxu0 %v695_v27  ;;  %v812_v51 = vld [vmem:[#allocation2 + $0x124] sm:$0xf]  ;;  %v801_v52 = vld [vmem:[#allocation2 + $0xc8] sm:$0xf0]  ;;  %v704_v53 = vld [vmem:[#allocation2 + $0x13c] sm:$0xf0]  ;;  %v643_v56 = vor.u32 %v797_v46, %v640_v49 }
  0x13   :  { %452 = vmatpush.bf16.msra.mxu1 %v699_v29  ;;  %465 = vmatpush.bf16.msra.mxu2 %v703_v34  ;;  %v707_v55 = vor.u32 %v812_v51, %v704_v53  ;;  %v610_v57 = vld [vmem:[#allocation2 + $0x70] sm:$0xf]  ;;  %v793_v58 = vld [vmem:[#allocation2 + $0x88] sm:$0xf0]  ;;  %v647_v59 = vor.u32 %v801_v52, %v646_v50  ;;  %v790_v60 = vld [vmem:[#allocation2 + $0x74] sm:$0xf] }
  0x14   :  { %v612_v61 = vld [vmem:[#allocation2 + $0x8c] sm:$0xf0]  ;;  %v618_v62 = vld [vmem:[#allocation2 + $0x78] sm:$0xf]  ;;  %v794_v63 = vld [vmem:[#allocation2 + $0x90] sm:$0xf0]  ;;  %v611_v0 = vor.u32 %v793_v58, %v610_v57 }
  0x15   :  { %477 = vmatpush.bf16.msra.mxu3 %v735_v47  ;;  %v615_v2 = vor.u32 %v790_v60, %v612_v61  ;;  %v619_v3 = vor.u32 %v794_v63, %v618_v62  ;;  %v582_v4 = vld [vmem:[#allocation2 + $0x38] sm:$0xf]  ;;  %v786_v5 = vld [vmem:[#allocation2 + $0x50] sm:$0xf0]  ;;  %v783_v6 = vld [vmem:[#allocation2 + $0x3c] sm:$0xf] }
  0x16   :  { %440 = vmatpush.bf16.msra.mxu0 %v667_v40  ;;  %v583_v7 = vor.u32 %v786_v5, %v582_v4  ;;  %v584_v8 = vld [vmem:[#allocation2 + $0x54] sm:$0xf0]  ;;  %v590_v9 = vld [vmem:[#allocation2 + $0x40] sm:$0xf]  ;;  %v787_v10 = vld [vmem:[#allocation2 + $0x58] sm:$0xf0] }
  0x17   :  { %453 = vmatpush.bf16.msra.mxu1 %v671_v43  ;;  %466 = vmatpush.bf16.msra.mxu2 %v675_v48  ;;  %v587_v11 = vor.u32 %v783_v6, %v584_v8  ;;  %v591_v12 = vor.u32 %v787_v10, %v590_v9  ;;  %v676_v13 = vld [vmem:[#allocation2 + $0x104] sm:$0xf0]  ;;  %v554_v14 = vld [vmem:[#allocation2] sm:$0xf]  ;;  %v779_v16 = vld [vmem:[#allocation2 + $0x18] sm:$0xf0] }
  0x18   :  { %v776_v17 = vld [vmem:[#allocation2 + $0x4] sm:$0xf]  ;;  %v556_v18 = vld [vmem:[#allocation2 + $0x1c] sm:$0xf0]  ;;  %v555_v19 = vor.u32 %v779_v16, %v554_v14  ;;  %v562_v21 = vld [vmem:[#allocation2 + $0x8] sm:$0xf] }
  0x19   :  { %842 = vset.pattern.permute.xlu0 %v903_v1  ;;  %478 = vmatpush.bf16.msra.mxu3 %v707_v55  ;;  %v805_v1 = vld [vmem:[#allocation2 + $0xec] sm:$0xf]  ;;  %v559_v20 = vor.u32 %v776_v17, %v556_v18  ;;  %v780_v22 = vld [vmem:[#allocation2 + $0x20] sm:$0xf0]  ;;  %v798_v23 = vld [vmem:[#allocation2 + $0xb4] sm:$0xf] }
  0x1a   :  { %441 = vmatpush.bf16.msra.mxu0 %v639_v54  ;;  %v679_v15 = vor.u32 %v805_v1, %v676_v13  ;;  %v563_v24 = vor.u32 %v780_v22, %v562_v21  ;;  %v648_v25 = vld [vmem:[#allocation2 + $0xcc] sm:$0xf0]  ;;  %v766_v26 = vld [vmem:[#allocation2 + $0x198] sm:$0xf]  ;;  %v830_v27 = vld [vmem:[#allocation2 + $0x1b0] sm:$0xf0] }
  0x1b   :  { %454 = vmatpush.bf16.msra.mxu1 %v643_v56  ;;  %467 = vmatpush.bf16.msra.mxu2 %v647_v59  ;;  %v651_v28 = vor.u32 %v798_v23, %v648_v25  ;;  %v767_v29 = vor.u32 %v830_v27, %v766_v26  ;;  %v827_v30 = vld [vmem:[#allocation2 + $0x19c] sm:$0xf]  ;;  %v768_v31 = vld [vmem:[#allocation2 + $0x1b4] sm:$0xf0]  ;;  %v774_v32 = vld [vmem:[#allocation2 + $0x1a0] sm:$0xf] }
  0x1c   :  { %v771_v33 = vor.u32 %v827_v30, %v768_v31  ;;  %v831_v34 = vld [vmem:[#allocation2 + $0x1b8] sm:$0xf0]  ;;  %v620_v37 = vld [vmem:[#allocation2 + $0x94] sm:$0xf0]  ;;  %v738_v38 = vld [vmem:[#allocation2 + $0x160] sm:$0xf] }
  0x1d   :  { %479 = vmatpush.bf16.msra.mxu3 %v679_v15  ;;  %v775_v35 = vor.u32 %v831_v34, %v774_v32  ;;  %v791_v36 = vld [vmem:[#allocation2 + $0x7c] sm:$0xf]  ;;  %v820_v41 = vld [vmem:[#allocation2 + $0x164] sm:$0xf]  ;;  %v740_v42 = vld [vmem:[#allocation2 + $0x17c] sm:$0xf0] }
  0x1e   :  { %442 = vmatpush.bf16.msra.mxu0 %v611_v0  ;;  %v623_v39 = vor.u32 %v791_v36, %v620_v37  ;;  %v823_v40 = vld [vmem:[#allocation2 + $0x178] sm:$0xf0]  ;;  %v743_v44 = vor.u32 %v820_v41, %v740_v42  ;;  %v746_v45 = vld [vmem:[#allocation2 + $0x168] sm:$0xf]  ;;  %v824_v46 = vld [vmem:[#allocation2 + $0x180] sm:$0xf0] }
  0x1f   :  { %455 = vmatpush.bf16.msra.mxu1 %v615_v2  ;;  %468 = vmatpush.bf16.msra.mxu2 %v619_v3  ;;  %v739_v43 = vor.u32 %v823_v40, %v738_v38  ;;  %v747_v47 = vor.u32 %v824_v46, %v746_v45  ;;  %v784_v48 = vld [vmem:[#allocation2 + $0x44] sm:$0xf]  ;;  %v592_v49 = vld [vmem:[#allocation2 + $0x5c] sm:$0xf0]  ;;  %v710_v51 = vld [vmem:[#allocation2 + $0x128] sm:$0xf] }
  0x20   :  { %v595_v50 = vor.u32 %v784_v48, %v592_v49  ;;  %v816_v52 = vld [vmem:[#allocation2 + $0x140] sm:$0xf0]  ;;  %v813_v53 = vld [vmem:[#allocation2 + $0x12c] sm:$0xf]  ;;  %v712_v55 = vld [vmem:[#allocation2 + $0x144] sm:$0xf0] }
  0x21   :  { %480 = vmatpush.bf16.msra.mxu3 %v651_v28  ;;  %v711_v54 = vor.u32 %v816_v52, %v710_v51  ;;  %v718_v56 = vld [vmem:[#allocation2 + $0x130] sm:$0xf]  ;;  %v817_v57 = vld [vmem:[#allocation2 + $0x148] sm:$0xf0]  ;;  %v715_v58 = vor.u32 %v813_v53, %v712_v55  ;;  %v564_v61 = vld [vmem:[#allocation2 + $0x24] sm:$0xf0] }
  0x22   :  { %443 = vmatpush.bf16.msra.mxu0 %v583_v7  ;;  %v719_v59 = vor.u32 %v817_v57, %v718_v56  ;;  %v777_v60 = vld [vmem:[#allocation2 + $0xc] sm:$0xf]  ;;  %v682_v62 = vld [vmem:[#allocation2 + $0xf0] sm:$0xf]  ;;  %v806_v2 = vld [vmem:[#allocation2 + $0xf4] sm:$0xf] }
  0x23   :  { %456 = vmatpush.bf16.msra.mxu1 %v587_v11  ;;  %469 = vmatpush.bf16.msra.mxu2 %v591_v12  ;;  %v567_v63 = vor.u32 %v777_v60, %v564_v61  ;;  %v809_v0 = vld [vmem:[#allocation2 + $0x108] sm:$0xf0]  ;;  %v684_v3 = vld [vmem:[#allocation2 + $0x10c] sm:$0xf0]  ;;  %v690_v6 = vld [vmem:[#allocation2 + $0xf8] sm:$0xf] }
  0x24   :  { %v683_v4 = vor.u32 %v809_v0, %v682_v62  ;;  %v687_v5 = vor.u32 %v806_v2, %v684_v3  ;;  %v810_v7 = vld [vmem:[#allocation2 + $0x110] sm:$0xf0]  ;;  %v654_v9 = vld [vmem:[#allocation2 + $0xb8] sm:$0xf]  ;;  %v799_v11 = vld [vmem:[#allocation2 + $0xbc] sm:$0xf] }
  0x25   :  { %481 = vmatpush.bf16.msra.mxu3 %v623_v39  ;;  %v691_v8 = vor.u32 %v810_v7, %v690_v6  ;;  %v802_v10 = vld [vmem:[#allocation2 + $0xd0] sm:$0xf0]  ;;  %v656_v1 = vld [vmem:[#allocation2 + $0xd4] sm:$0xf0]  ;;  %v662_v13 = vld [vmem:[#allocation2 + $0xc0] sm:$0xf] }
  0x26   :  { %444 = vmatpush.bf16.msra.mxu0 %v555_v19  ;;  %v655_v12 = vor.u32 %v802_v10, %v654_v9  ;;  %v803_v14 = vld [vmem:[#allocation2 + $0xd8] sm:$0xf0]  ;;  %v659_v15 = vor.u32 %v799_v11, %v656_v1  ;;  %v626_v17 = vld [vmem:[#allocation2 + $0x80] sm:$0xf]  ;;  %v792_v19 = vld [vmem:[#allocation2 + $0x84] sm:$0xf] }
  0x27   :  { %457 = vmatpush.bf16.msra.mxu1 %v559_v20  ;;  %470 = vmatpush.bf16.msra.mxu2 %v563_v24  ;;  %v663_v16 = vor.u32 %v803_v14, %v662_v13  ;;  %v795_v18 = vld [vmem:[#allocation2 + $0x98] sm:$0xf0]  ;;  %v628_v21 = vld [vmem:[#allocation2 + $0x9c] sm:$0xf0]  ;;  %v634_v22 = vld [vmem:[#allocation2 + $0x88] sm:$0xf] }
  0x28   :  { %v627_v20 = vor.u32 %v795_v18, %v626_v17  ;;  %v796_v23 = vld [vmem:[#allocation2 + $0xa0] sm:$0xf0]  ;;  %v631_v24 = vor.u32 %v792_v19, %v628_v21  ;;  %v598_v26 = vld [vmem:[#allocation2 + $0x48] sm:$0xf]  ;;  %v785_v28 = vld [vmem:[#allocation2 + $0x4c] sm:$0xf] }
  0x29   :  { %482 = vmatpush.bf16.msra.mxu3 %v595_v50  ;;  %v635_v25 = vor.u32 %v796_v23, %v634_v22  ;;  %v788_v27 = vld [vmem:[#allocation2 + $0x60] sm:$0xf0]  ;;  %v606_v30 = vld [vmem:[#allocation2 + $0x50] sm:$0xf]  ;;  %v789_v31 = vld [vmem:[#allocation2 + $0x68] sm:$0xf0] }
  0x2a   :  { %489 = vmatpush.bf16.msrb.mxu0 %v767_v29  ;;  %v600_v29 = vld [vmem:[#allocation2 + $0x64] sm:$0xf0]  ;;  %v599_v32 = vor.u32 %v788_v27, %v598_v26  ;;  %v607_v34 = vor.u32 %v789_v31, %v606_v30  ;;  %v781_v36 = vld [vmem:[#allocation2 + $0x28] sm:$0xf0]  ;;  %v778_v37 = vld [vmem:[#allocation2 + $0x14] sm:$0xf] }
  0x2b   :  { %502 = vmatpush.bf16.msrb.mxu1 %v771_v33  ;;  %515 = vmatpush.bf16.msrb.mxu2 %v775_v35  ;;  %v603_v33 = vor.u32 %v785_v28, %v600_v29  ;;  %v570_v35 = vld [vmem:[#allocation2 + $0x10] sm:$0xf]  ;;  %v578_v39 = vld [vmem:[#allocation2 + $0x18] sm:$0xf]  ;;  %v782_v40 = vld [vmem:[#allocation2 + $0x30] sm:$0xf0] }
  0x2c   :  { %v572_v38 = vld [vmem:[#allocation2 + $0x2c] sm:$0xf0]  ;;  %v571_v42 = vor.u32 %v781_v36, %v570_v35  ;;  %v843_v45 = vld [vmem:[%s963_s1] ss:$0 sm:$0xff]  ;;  %v844_v46 = vld [vmem:[%s963_s1 + $0x1] ss:$0 sm:$0xff] }
  0x2d   :  { %483 = vmatpush.bf16.msra.mxu3 %v567_v63  ;;  %s542_s11 = sshll.u32 %s967_s5, 4  ;;  %s543_s11 = int_to_ptr.hbm [resolvable:$true] %s542_s11 }
  0x2e   :  { %490 = vmatpush.bf16.msrb.mxu0 %v739_v43  ;;  %v575_v43 = vor.u32 %v778_v37, %v572_v38 }
  0x2f   :  { %503 = vmatpush.bf16.msrb.mxu1 %v743_v44  ;;  %516 = vmatpush.bf16.msrb.mxu2 %v747_v47  ;;  %v579_v44 = vor.u32 %v782_v40, %v578_v39  ;;  %v845_v47 = vld [vmem:[%s963_s1 + $0x2] ss:$0 sm:$0xff] }
  0x32   :  { %491 = vmatpush.bf16.msrb.mxu0 %v711_v54  ;;  %v846_v54 = vld [vmem:[%s964_s2] ss:$0 sm:$0xff]  ;;  %s905_s2 = smov [#allocation5]  }
  0x33   :  { %504 = vmatpush.bf16.msrb.mxu1 %v715_v58  ;;  %517 = vmatpush.bf16.msrb.mxu2 %v719_v59  ;;  %v133_v59 = vld [vmem:[%s966_s4] sm:$0xff]  ;;  %s540_s4 = sshll.u32 %s905_s2, 4  ;;  %s541_s4 = int_to_ptr.vmem [resolvable:$true] %s540_s4 }
  0x34   :  { %v135_v60 = vperm.slane %v133_v59, 0  ;;  %v136_v61 = vperm.slane %v133_v59, 1  ;;  %v137_v3 = vperm.slane %v133_v59, 2  ;;  %v139_v11 = vperm.slane %v133_v59, 4 }
  0x35   :  { %v141_v18 = vperm.slane %v133_v59, 6 }
  0x36   :  { %492 = vmatpush.bf16.msrb.mxu0 %v683_v4  ;;  %v138_v4 = vperm.slane %v133_v59, 3 }
  0x37   :  { %505 = vmatpush.bf16.msrb.mxu1 %v687_v5  ;;  %518 = vmatpush.bf16.msrb.mxu2 %v691_v8 }
  0x3a   :  { %493 = vmatpush.bf16.msrb.mxu0 %v655_v12  ;;  %v140_v12 = vperm.slane %v133_v59, 5 }
  0x3b   :  { %506 = vmatpush.bf16.msrb.mxu1 %v659_v15  ;;  %519 = vmatpush.bf16.msrb.mxu2 %v663_v16 }
  0x3e   :  { %494 = vmatpush.bf16.msrb.mxu0 %v627_v20 }
  0x3f   :  { %507 = vmatpush.bf16.msrb.mxu1 %v631_v24  ;;  %520 = vmatpush.bf16.msrb.mxu2 %v635_v25 }
  0x42   :  { %495 = vmatpush.bf16.msrb.mxu0 %v599_v32 }
  0x43   :  { %508 = vmatpush.bf16.msrb.mxu1 %v603_v33  ;;  %521 = vmatpush.bf16.msrb.mxu2 %v607_v34 }
  0x46   :  { %496 = vmatpush.bf16.msrb.mxu0 %v571_v42 }
  0x47   :  { %509 = vmatpush.bf16.msrb.mxu1 %v575_v43  ;;  %522 = vmatpush.bf16.msrb.mxu2 %v579_v44 }
  0x7a   :  { %v42_v41 = vpop.permute.xlu0 %41  ;;  %v57_v48 = vpop.permute.xlu1 %56 }
  0x7b   :  { %v45_v50 = vmul.f32 %v843_v45, %v42_v41  ;;  %v60_v52 = vmul.f32 %v845_v47, %v57_v48 }
  0x83   :  { %v49_v49 = vpop.permute.xlu0 %48 }
  0x84   :  { %v52_v51 = vmul.f32 %v844_v46, %v49_v49 }
  0x86   :  { %v53_v53 = vadd.f32 %v52_v51, %v45_v50 }
  0x88   :  { %v61_v55 = vadd.f32 %v60_v52, %v53_v53 }
  0x8a   :  { %v66_v56 = vadd.f32 %v846_v54, %v61_v55 }
  0x8c   :  { %v67_v57 = vmax.f32 %v66_v56, 0.0 }
  0x8e   :  { %v68_v58 = vpack.c.bf16 %v67_v57, %v67_v57 }
  0x90   :  { %445 = vmatmul.bf16.vlgmr.msra.gmra.mxu0 %v68_v58  ;;  %458 = vmatmul.bf16.vlgmr.msra.gmra.mxu1 %v68_v58 }
  0x91   :  { %471 = vmatmul.bf16.vlgmr.msra.gmra.mxu2 %v68_v58  ;;  %484 = vmatmul.bf16.vlgmr.msra.gmra.mxu3 %v68_v58 }
  0xa0   :  { %497 = vmatmul.bf16.vlgmr.msrb.gmra.mxu0 %v68_v58  ;;  %510 = vmatmul.bf16.vlgmr.msrb.gmra.mxu1 %v68_v58 }
  0xa1   :  { %523 = vmatmul.bf16.vlgmr.msrb.gmra.mxu2 %v68_v58 }
 0x10d   :  { %v446_v62 = vpop.f32.mrf.mxu0  ;;  %v459_v63 = vpop.f32.mrf.mxu1 }
 0x10e   :  { %v447_v0 = vadd.f32 %v446_v62, %v135_v60  ;;  %v460_v2 = vadd.f32 %v459_v63, %v136_v61 }
 0x110   :  { %528 = vst [vmem:[#allocation5] sm:$0xff] %v447_v0 }
 0x111   :  { %529 = vst [vmem:[#allocation5 + $0x8] sm:$0xff] %v460_v2 }
 0x114   :  { %v472_v5 = vpop.f32.mrf.mxu2  ;;  %v485_v6 = vpop.f32.mrf.mxu3 }
 0x115   :  { %v473_v7 = vadd.f32 %v472_v5, %v137_v3  ;;  %v486_v8 = vadd.f32 %v485_v6, %v138_v4  ;;  %v448_v9 = vpop.f32.mrf.mxu0  ;;  %v461_v10 = vpop.f32.mrf.mxu1 }
 0x117   :  { %530 = vst [vmem:[#allocation5 + $0x10] sm:$0xff] %v473_v7 }
 0x118   :  { %531 = vst [vmem:[#allocation5 + $0x18] sm:$0xff] %v486_v8 }
 0x11c   :  { %v474_v1 = vpop.f32.mrf.mxu2  ;;  %v487_v13 = vpop.f32.mrf.mxu3 }
 0x11d   :  { %v498_v14 = vpop.f32.mrf.mxu0  ;;  %v511_v15 = vpop.f32.mrf.mxu1 }
 0x11e   :  { %v499_v16 = vadd.f32 %v498_v14, %v139_v11  ;;  %v512_v17 = vadd.f32 %v511_v15, %v140_v12 }
 0x120   :  { %532 = vst [vmem:[#allocation5 + $0x20] sm:$0xff] %v499_v16 }
 0x121   :  { %533 = vst [vmem:[#allocation5 + $0x28] sm:$0xff] %v512_v17 }
 0x124   :  { %v524_v19 = vpop.f32.mrf.mxu2 }
 0x125   :  { %v525_v20 = vadd.f32 %v524_v19, %v141_v18  ;;  %v500_v21 = vpop.f32.mrf.mxu0  ;;  %v513_v22 = vpop.f32.mrf.mxu1 }
 0x127   :  { %534 = vst [vmem:[#allocation5 + $0x30] sm:$0xff] %v525_v20 }
 0x128   :  { %545 = dma.vmem_to_hbm [thread:$0]  %s541_s4, 896, %s543_s11, [#allocation4]  }
 0x12c   :  { %v526_v23 = vpop.f32.mrf.mxu2 }
 0x12d   :  { %897 = dma.done.wait [#allocation4], 896  }
 0x12e   :  { %898 = vsyncadd [#allocation4], 4294966400 }
 0x12f   :  { %550 = vsyncpa [#allocation3], 1 }
 0x130   :  { %551 = vsyncpa [#allocation4], 1 }

</bundles_post_ra>
